<compile_context>
chip_gen: v6e
topology: v6e:2x2x1
jax: 0.10.0
libtpu: 0.0.40
codegen_flags: <defaults>
</compile_context>

<pallas_src>
import functools

import numpy as np
import jax
import jax.numpy as jnp
from jax import lax
from jax.experimental import pallas as pl
from jax.experimental.pallas import tpu as pltpu

LRELU_SLOPE = 0.1


def get_padding(kernel_size, dilation=1):
    return int((kernel_size * dilation - dilation) / 2)


def _round_up(x, m):
    return ((x + m - 1) // m) * m


# ---------------------------------------------------------------------------
# Pallas kernel: single matmul tile + bias + (optional) leaky relu
# ---------------------------------------------------------------------------
def _matmul_bias_act_kernel(x_ref, w_ref, b_ref, o_ref, *, slope, apply_act):
    # x_ref: (TM, Kc_pad) bf16, w_ref: (Kc_pad, TN) bf16, b_ref: (1, TN) f32
    acc = jnp.dot(x_ref[...], w_ref[...], preferred_element_type=jnp.float32)
    acc = acc + b_ref[...]
    if apply_act:
        acc = jnp.where(acc >= 0, acc, slope * acc)
    o_ref[...] = acc.astype(o_ref.dtype)


def conv2d_kx1_pallas(x_nhwc, w, b, *, stride, padding, apply_act,
                      out_dtype=jnp.float32):
    """Conv2d with kernel (K,1), stride (stride,1), padding (padding,0), fused act.

    x_nhwc: (B, H, W, C_store) where C_store >= w.shape[1] (extra channels are zeros).
    w: (K, C_in, C_out), b: (C_out,)
    Returns (B, H_out, W, C_out_pad) with C_out_pad = round_up(C_out, 128); channels
    >= C_out are exactly zero (zero weight cols, zero bias, leaky_relu(0)=0).
    """
    B, H, W, C_store = x_nhwc.shape
    K, C_in, C_out = w.shape
    assert C_in <= C_store
    H_out = (H + 2 * padding - K) // stride + 1
    M = B * H_out * W

    # ---- glue in plain JAX: bf16 cast + im2col with taps folded into the channel dim
    xb = x_nhwc.astype(jnp.bfloat16)
    xp = jnp.pad(xb, ((0, 0), (padding, padding), (0, 0), (0, 0)))
    taps = [xp[:, t:t + stride * H_out:stride] for t in range(K)]      # (B,H_out,W,C_store)
    x_col = jnp.concatenate(taps, axis=-1).reshape(M, K * C_store)     # tap-major folding

    # weights: pad C_in -> C_store (zero rows), fold taps, pad C_out -> 128 multiple
    Kc = K * C_store
    Kc_pad = _round_up(max(Kc, 128), 128)
    C_out_pad = _round_up(max(C_out, 128), 128)
    w_p = jnp.pad(w, ((0, 0), (0, C_store - C_in), (0, 0)))            # (K, C_store, C_out)
    w_fold = w_p.reshape(Kc, C_out)
    w_fold = jnp.pad(w_fold, ((0, Kc_pad - Kc), (0, C_out_pad - C_out)))
    w_fold = w_fold.astype(jnp.bfloat16)
    b_p = jnp.pad(b, (0, C_out_pad - C_out)).reshape(1, C_out_pad).astype(jnp.float32)

    if Kc_pad != Kc:
        x_col = jnp.pad(x_col, ((0, 0), (0, Kc_pad - Kc)))

    # ---- tiling: tile M (rows) and C_out; weight tile resident across M steps
    TM = 512
    M8 = _round_up(M, 8)
    if M8 <= TM:
        TM = M8
        M_pad = M8
    else:
        M_pad = _round_up(M, TM)
    if M_pad != M:
        x_col = jnp.pad(x_col, ((0, M_pad - M), (0, 0)))

    TN = 256 if (C_out_pad % 256 == 0) else 128
    n_m = M_pad // TM
    n_n = C_out_pad // TN

    kernel = functools.partial(_matmul_bias_act_kernel, slope=LRELU_SLOPE,
                               apply_act=apply_act)
    out = pl.pallas_call(
        kernel,
        out_shape=jax.ShapeDtypeStruct((M_pad, C_out_pad), out_dtype),
        grid_spec=pltpu.PrefetchScalarGridSpec(
            num_scalar_prefetch=0,
            # C_out axis outermost: weight block index depends only on j, so the
            # weight tile stays resident across the inner M sweep.
            grid=(n_n, n_m),
            in_specs=[
                pl.BlockSpec((TM, Kc_pad), lambda j, i: (i, 0)),
                pl.BlockSpec((Kc_pad, TN), lambda j, i: (0, j)),
                pl.BlockSpec((1, TN), lambda j, i: (0, j)),
            ],
            out_specs=pl.BlockSpec((TM, TN), lambda j, i: (i, j)),
        ),
        compiler_params=pltpu.CompilerParams(
            dimension_semantics=("parallel", "parallel"),
            vmem_limit_bytes=48 * 1024 * 1024,   # headroom for v7x's 64 MiB VMEM
        ),
    )(x_col, w_fold, b_p)

    out = out[:M]                                # drop M padding rows
    return out.reshape(B, H_out, W, C_out_pad)


# ---------------------------------------------------------------------------
# DiscriminatorP forward
# ---------------------------------------------------------------------------
_CONV_CFGS = [(5, 3, get_padding(5, 1))] * 4 + [(5, 1, 2)]   # (kernel, stride, pad)


def discriminator_p_forward(x, params, period):
    # x: (B, 1, T)  -- matches the PyTorch NCT input
    B, C, T = x.shape
    if T % period != 0:
        n_pad = period - T % period
        x = jnp.pad(x, ((0, 0), (0, 0), (0, n_pad)), mode="reflect")
        T = T + n_pad
    x = x.reshape(B, C, T // period, period)            # NCHW view
    x = jnp.transpose(x, (0, 2, 3, 1))                  # -> NHWC for the kernels

    fmap = []
    for (k, s, p), (w, b) in zip(_CONV_CFGS, params["convs"]):
        c_out = w.shape[-1]
        x = conv2d_kx1_pallas(x, w, b, stride=s, padding=p, apply_act=True)
        # fmap in NCHW (real channels only) to match PyTorch
        fmap.append(jnp.transpose(x[..., :c_out], (0, 3, 1, 2)))

    w, b = params["conv_post"]
    c_out = w.shape[-1]
    x = conv2d_kx1_pallas(x, w, b, stride=1, padding=1, apply_act=False)
    x_nchw = jnp.transpose(x[..., :c_out], (0, 3, 1, 2))
    fmap.append(x_nchw)
    x_flat = x_nchw.reshape(B, -1)                      # torch.flatten(x, 1, -1)
    return x_flat, fmap


# ---------------------------------------------------------------------------
# Deterministic parameter init (weight_norm is folded into plain weights)
# ---------------------------------------------------------------------------
def init_params(key, kernel_size=5):
    chans = [(1, 32), (32, 128), (128, 512), (512, 1024), (1024, 1024)]
    params = {"convs": []}
    for ci, co in chans:
        key, k1, k2 = jax.random.split(key, 3)
        w = jax.random.normal(k1, (kernel_size, ci, co), jnp.float32) / np.sqrt(ci * kernel_size)
        b = 0.01 * jax.random.normal(k2, (co,), jnp.float32)
        params["convs"].append((w, b))
    key, k1, k2 = jax.random.split(key, 3)
    wp = jax.random.normal(k1, (3, 1024, 1), jnp.float32) / np.sqrt(1024 * 3)
    bp = 0.01 * jax.random.normal(k2, (1,), jnp.float32)
    params["conv_post"] = (wp, bp)
    return params


# ---------------------------------------------------------------------------
# Pure-JAX reference (NCHW, lax.conv, f32) for verification
# ---------------------------------------------------------------------------
def reference_forward(x, params, period):
    B, C, T = x.shape
    if T % period != 0:
        n_pad = period - T % period
        x = jnp.pad(x, ((0, 0), (0, 0), (0, n_pad)), mode="reflect")
        T = T + n_pad
    x = x.reshape(B, C, T // period, period)
    fmap = []
    for (k, s, p), (w, b) in zip(_CONV_CFGS, params["convs"]):
        w_oihw = jnp.transpose(w, (2, 1, 0))[..., None]
        x = lax.conv_general_dilated(x, w_oihw, (s, 1), ((p, p), (0, 0)),
                                     dimension_numbers=("NCHW", "OIHW", "NCHW"),
                                     precision=lax.Precision.HIGHEST)
        x = x + b.reshape(1, -1, 1, 1)
        x = jnp.where(x >= 0, x, LRELU_SLOPE * x)
        fmap.append(x)
    w, b = params["conv_post"]
    w_oihw = jnp.transpose(w, (2, 1, 0))[..., None]
    x = lax.conv_general_dilated(x, w_oihw, (1, 1), ((1, 1), (0, 0)),
                                 dimension_numbers=("NCHW", "OIHW", "NCHW"),
                                 precision=lax.Precision.HIGHEST)
    x = x + b.reshape(1, -1, 1, 1)
    fmap.append(x)
    return x.reshape(B, -1), fmap


if __name__ == "__main__":
    key = jax.random.PRNGKey(0)
    key, kx = jax.random.split(key)
    B, T, period = 2, 16, 3
    x = jax.random.normal(kx, (B, 1, T), jnp.float32)
    params = init_params(key)

    out, fmap = discriminator_p_forward(x, params, period)
    out = jax.block_until_ready(out)
    fmap = [jax.block_until_ready(f) for f in fmap]

    ref_out, ref_fmap = reference_forward(x, params, period)
    ref_out = jax.block_until_ready(ref_out)

    # bf16 matmul operands (f32 accumulation) -> slightly relaxed tolerance.
    np.testing.assert_allclose(np.asarray(out), np.asarray(ref_out),
                               rtol=5e-2, atol=5e-2)
    assert len(fmap) == 6
    for f, rf in zip(fmap, ref_fmap):
        assert f.shape == rf.shape, (f.shape, rf.shape)
        np.testing.assert_allclose(np.asarray(f), np.asarray(rf),
                                   rtol=5e-2, atol=5e-2)

    print("KERNEL_OK")
</pallas_src>

<mosaic_0001>
module attributes {stable_mosaic.version = 11 : i64} {
  func.func @_matmul_bias_act_kernel(%arg0: i32, %arg1: i32, %arg2: memref<16x128xbf16, #tpu.memory_space<vmem>>, %arg3: memref<128x128xbf16, #tpu.memory_space<vmem>>, %arg4: memref<1x128xf32, #tpu.memory_space<vmem>>, %arg5: memref<16x128xf32, #tpu.memory_space<vmem>>) attributes {dimension_semantics = [#tpu.dimension_semantics<parallel>, #tpu.dimension_semantics<parallel>], iteration_bounds = array<i64: 1, 1>, scalar_prefetch = 0 : i64, scratch_operands = 0 : i64, tpu.core_type = #tpu.core_type<tc>, window_params = [{transform_indices = @transform_0, window_bounds = array<i64: 16, 128>}, {transform_indices = @transform_1, window_bounds = array<i64: 128, 128>}, {transform_indices = @transform_2, window_bounds = array<i64: 1, 128>}, {transform_indices = @transform_3, window_bounds = array<i64: 16, 128>}]} {
    %c0 = arith.constant 0 : index
    %c0_0 = arith.constant 0 : index
    %0 = vector.load %arg2[%c0, %c0_0] : memref<16x128xbf16, #tpu.memory_space<vmem>>, vector<16x128xbf16>
    %c0_1 = arith.constant 0 : index
    %c0_2 = arith.constant 0 : index
    %1 = vector.load %arg3[%c0_1, %c0_2] : memref<128x128xbf16, #tpu.memory_space<vmem>>, vector<128x128xbf16>
    %cst = arith.constant dense<0.000000e+00> : vector<16x128xf32>
    %2 = tpu.matmul %0, %1, %cst {dimension_numbers = #tpu.dot_dimension_numbers<[1], [0], [0], [1], [0, 0, 1, 1], [], []>} : vector<16x128xbf16>, vector<128x128xbf16>, vector<16x128xf32> -> vector<16x128xf32>
    %c0_3 = arith.constant 0 : index
    %c0_4 = arith.constant 0 : index
    %3 = vector.load %arg4[%c0_3, %c0_4] : memref<1x128xf32, #tpu.memory_space<vmem>>, vector<1x128xf32>
    %4 = vector.broadcast %3 : vector<1x128xf32> to vector<16x128xf32>
    %5 = arith.addf %2, %4 : vector<16x128xf32>
    %cst_5 = arith.constant 0.000000e+00 : f32
    %6 = vector.broadcast %cst_5 : f32 to vector<16x128xf32>
    %7 = arith.cmpf oge, %5, %6 : vector<16x128xf32>
    %cst_6 = arith.constant 1.000000e-01 : f32
    %8 = vector.broadcast %cst_6 : f32 to vector<16x128xf32>
    %9 = arith.mulf %8, %5 : vector<16x128xf32>
    %10 = arith.select %7, %5, %9 : vector<16x128xi1>, vector<16x128xf32>
    %c0_7 = arith.constant 0 : index
    %c0_8 = arith.constant 0 : index
    %11 = vector.load %arg5[%c0_7, %c0_8] : memref<16x128xf32, #tpu.memory_space<vmem>>, vector<16x128xf32>
    tpu.vector_store %arg5[%c0_7, %c0_8], %10 {strides = array<i32>} : memref<16x128xf32, #tpu.memory_space<vmem>>, vector<16x128xf32>,
    return
  }
  func.func @transform_0(%arg0: i32, %arg1: i32) -> (i32, i32) {
    %c0_i32 = arith.constant 0 : i32
    %c0_i32_0 = arith.constant 0 : i32
    return %arg1, %c0_i32 : i32, i32
  }
  func.func @transform_1(%arg0: i32, %arg1: i32) -> (i32, i32) {
    %c0_i32 = arith.constant 0 : i32
    %c0_i32_0 = arith.constant 0 : i32
    return %c0_i32, %arg0 : i32, i32
  }
  func.func @transform_2(%arg0: i32, %arg1: i32) -> (i32, i32) {
    %c0_i32 = arith.constant 0 : i32
    %c0_i32_0 = arith.constant 0 : i32
    return %c0_i32, %arg0 : i32, i32
  }
  func.func @transform_3(%arg0: i32, %arg1: i32) -> (i32, i32) {
    %c0_i32 = arith.constant 0 : i32
    return %arg1, %arg0 : i32, i32
  }
}

</mosaic_0001>

<bundles_post_ra>
// kernel: tpu_custom_call.1
= control target key start
LH: loop header
LB: loop body
LE: loop exit
PB: predicated region body
PF: predicated region fallthrough
CT: control target
= control target key end

     0   :  { %8 = vsyncpa [#allocation3], 0  ;;  %s354_s0 = inlined_call_operand.hbm [shape: bf16[16,128], index: 0, kind: input, shape index: {}]   ;;  %s355_s1 = inlined_call_operand.hbm [shape: bf16[128,128], index: 1, kind: input, shape index: {}]   ;;  %s356_s2 = inlined_call_operand.vmem [shape: f32[1,128], index: 2, kind: input, shape index: {}]   ;;  %s357_s3 = inlined_call_operand.hbm [shape: f32[16,128], index: 3, kind: output, shape index: {}]  }
   0x1   :  { %9 = vsyncpa [#allocation6], 0 }
   0x2   :  { %10 = vsyncpa [#allocation4], 0  ;;  %s313_s12 = smov [#allocation2]  }
   0x3   :  { %s16_s13 = sshll.u32 %s313_s12, 4  ;;  %s17_s13 = int_to_ptr.vmem [resolvable:$true] %s16_s13 }
   0x4   :  { %s255_s14 = scalar_lea.vmem %s17_s13, 128  ;;  %p260_p1 = scmp.lt.s32.totalorder %s17_s13, %s17_s13 }
   0x5   :  { %p256_p0 = scmp.ne.s32.totalorder %s17_s13, %s255_s14  ;;  %p261_p2 = scmp.lt.s32.totalorder %s255_s14, %s255_s14 }
   0x7   :  { %p262_p3 = por %p261_p2, %p260_p1 }
   0x9   :  { %p263_p4 = pnand %p262_p3, %p256_p0 }
   0xb   :  { %266 = shalt.err (!%p263_p4)
}
   0xc   :  { %s314_s15 = smov 64   ;;  %s315_s16 = smov 4  }
   0xd   :  { %22 = dma.hbm_to_vmem [thread:$0]  %s354_s0, 128, %s17_s13, [#allocation3], %s314_s15, %s314_s15, %s315_s16  }
   0xe   :  { %s316_s19 = smov [#allocation5]  }
   0xf   :  { %s28_s20 = sshll.u32 %s316_s19, 4  ;;  %s29_s20 = int_to_ptr.vmem [resolvable:$true] %s28_s20 }
  0x10   :  { %s275_s21 = scalar_lea.vmem %s29_s20, 1024  ;;  %p280_p6 = scmp.lt.s32.totalorder %s29_s20, %s29_s20 }
  0x11   :  { %p276_p5 = scmp.ne.s32.totalorder %s29_s20, %s275_s21  ;;  %p281_p7 = scmp.lt.s32.totalorder %s275_s21, %s275_s21 }
  0x13   :  { %p282_p8 = por %p281_p7, %p280_p6 }
  0x15   :  { %p283_p9 = pnand %p282_p8, %p276_p5 }
  0x17   :  { %286 = shalt.err (!%p283_p9)
}
  0x18   :  { %34 = dma.hbm_to_vmem [thread:$0]  %s355_s1, 1024, %s29_s20, [#allocation6], %s314_s15, %s314_s15, %s315_s16  }
  0x19   :  { %307 = dma.done.wait [#allocation3], 128  }
  0x1a   :  { %308 = vsyncadd [#allocation3], 4294967168 }
  0x1b   :  { %309 = dma.done.wait [#allocation6], 1024  }
  0x1c   :  { %310 = vsyncadd [#allocation6], 4294966272  ;;  %v317_v0 = vmov 0.0   ;;  %vm318_vm0 = vmmov 0   ;;  %v238_v1 = vld [vmem:[#allocation5 + $0x38] sm:$0xff]   ;;  %v239_v2 = vld [vmem:[#allocation5 + $0x30] sm:$0xff]  }
  0x1d   :  { %209 = vmatprep.subr.bf16.mxu0 %v317_v0  ;;  %225 = vmatprep.mubr.msk.bf16.mxu0 %vm318_vm0, %v317_v0  ;;  %v240_v3 = vld [vmem:[#allocation5 + $0x28] sm:$0xff]   ;;  %v241_v4 = vld [vmem:[#allocation5 + $0x20] sm:$0xff]   ;;  %v242_v5 = vld [vmem:[#allocation5 + $0x18] sm:$0xff]   ;;  %s319_s24 = smov [#allocation7]  }
  0x1e   :  { %210 = vmatpush3.bf16.msra.mxu0 %v238_v1  ;;  %v243_v6 = vld [vmem:[#allocation5 + $0x10] sm:$0xff]   ;;  %v244_v7 = vld [vmem:[#allocation5 + $0x8] sm:$0xff]   ;;  %v245_v8 = vld [vmem:[#allocation5] sm:$0xff]   ;;  %s177_s25 = sshll.u32 %s319_s24, 4  ;;  %s178_s25 = int_to_ptr.vmem [resolvable:$true] %s177_s25 }
  0x1f   :  { %211 = vmatprep.subr.bf16.mxu0 %v317_v0  ;;  %v246_v9 = vld [vmem:[#allocation2] sm:$0xff]   ;;  %s287_s26 = scalar_lea.vmem %s178_s25, 256  ;;  %p292_p11 = scmp.lt.s32.totalorder %s178_s25, %s178_s25 }
  0x20   :  { %v190_v10 = vld [vmem:[%s356_s2] ss:$0 sm:$0xff]  ;;  %p288_p10 = scmp.ne.s32.totalorder %s178_s25, %s287_s26  ;;  %p293_p12 = scmp.lt.s32.totalorder %s287_s26, %s287_s26 }
  0x22   :  { %212 = vmatpush3.bf16.msra.mxu0 %v239_v2  ;;  %p294_p13 = por %p293_p12, %p292_p11 }
  0x23   :  { %213 = vmatprep.subr.bf16.mxu0 %v317_v0 }
  0x24   :  { %p295_p0 = pnand %p294_p13, %p288_p10 }
  0x26   :  { %214 = vmatpush3.bf16.msra.mxu0 %v240_v3 }
  0x27   :  { %215 = vmatprep.subr.bf16.mxu0 %v317_v0 }
  0x2a   :  { %216 = vmatpush3.bf16.msra.mxu0 %v241_v4 }
  0x2b   :  { %217 = vmatprep.subr.bf16.mxu0 %v317_v0 }
  0x2e   :  { %218 = vmatpush3.bf16.msra.mxu0 %v242_v5 }
  0x2f   :  { %219 = vmatprep.subr.bf16.mxu0 %v317_v0 }
  0x32   :  { %220 = vmatpush3.bf16.msra.mxu0 %v243_v6 }
  0x33   :  { %221 = vmatprep.subr.bf16.mxu0 %v317_v0 }
  0x36   :  { %222 = vmatpush3.bf16.msra.mxu0 %v244_v7 }
  0x37   :  { %223 = vmatprep.subr.bf16.mxu0 %v317_v0 }
  0x3a   :  { %224 = vmatpush3.bf16.msra.mxu0 %v245_v8 }
  0x3d   :  { %226 = vmatmul.mubr.bf16.vlgmr.msra.gmra.mxu0 %v246_v9 }
  0xfd   :  { %v157_v11 = vpop.f32.mrf.mxu0 }
  0xfe   :  { %v158_v12 = vadd.f32 %v190_v10, %v157_v11 }
  0xff   :  { %v227_v13 = vpop.f32.mrf.mxu0 }
 0x100   :  { %vm164_vm1 = vcmp.ge.f32.partialorder %v158_v12, 0.0  ;;  %v166_v14 = vmul.f32 0.1, %v158_v12 }
 0x101   :  { %v160_v15 = vpop.f32.mrf.mxu0 }
 0x102   :  { %v168_v16 = vsel %vm164_vm1, %v158_v12, %v166_v14  ;;  %v161_v17 = vadd.f32 %v190_v10, %v160_v15 }
 0x103   :  { %170 = vst [vmem:[#allocation7] sm:$0xff] %v168_v16  ;;  %v228_v18 = vpop.f32.mrf.mxu0 }
 0x104   :  { %vm165_vm2 = vcmp.ge.f32.partialorder %v161_v17, 0.0  ;;  %v167_v19 = vmul.f32 0.1, %v161_v17 }
 0x106   :  { %v169_v20 = vsel %vm165_vm2, %v161_v17, %v167_v19 }
 0x107   :  { %171 = vst [vmem:[#allocation7 + $0x8] sm:$0xff] %v169_v20 }
 0x108   :  { %298 = shalt.err (!%p295_p0)
}
 0x109   :  { %s320_s2 = smov 128   ;;  %s321_s27 = smov 8  }
 0x10a   :  { %183 = dma.vmem_to_hbm [thread:$0]  %s178_s25, 256, %s357_s3, [#allocation4], %s320_s2, %s320_s2, %s321_s27  }
 0x10b   :  { %311 = dma.done.wait [#allocation4], 256  }
 0x10c   :  { %312 = vsyncadd [#allocation4], 4294967040 }
 0x10d   :  { %187 = vsyncpa [#allocation3], 1 }
 0x10e   :  { %188 = vsyncpa [#allocation6], 1 }
 0x10f   :  { %189 = vsyncpa [#allocation4], 1 }

</bundles_post_ra>
